<compile_context>
chip_gen: v7x
topology: tpu7x:2x2x1
jax: 0.10.0
libtpu: 0.0.40
codegen_flags: <defaults>
</compile_context>

<pallas_src>
import jax
import jax.numpy as jnp
from jax import lax
from jax.experimental import pallas as pl
from jax.experimental.pallas import tpu as pltpu

# ----------------------------- model constants ------------------------------
PCA_COMPONENTS = 128          # PCA_COMPUNENTS in the original script
NUM_CLASSES = 5               # len(label_to_index)
HIDDEN = 32                   # small stand-in for bert.config.hidden_size (768)
N_HEADS = 2
HEAD_DIM = HIDDEN // N_HEADS
FFN = 64
SEQ = 8
VOCAB = 100
BATCH = 8
FC1_OUT = 128
LANE = 128                    # lane-dense padded output width (>= NUM_CLASSES)


# ===================== fused pooler + classifier head kernel =================
def _head_kernel(cls_ref, tfidf_ref, wp_ref, bp_ref,
                 w1a_ref, w1b_ref, b1_ref, w2p_ref, b2p_ref, out_ref):
    """tanh(cls@Wp+bp) -> StandardScaler ++ StandardScaler(tfidf) -> fc1 -> relu -> fc2."""
    # BERT pooler: tanh(dense(hidden_state of [CLS] token))  (tanh -> EUP)
    pooled = jnp.tanh(
        jnp.dot(cls_ref[...], wp_ref[...], preferred_element_type=jnp.float32)
        + bp_ref[...])                                         # (B, HIDDEN)
    tfidf = tfidf_ref[...]                                     # (B, PCA_COMPONENTS)

    def standardize(x):
        # sklearn StandardScaler.fit_transform on the batch: per-column zero-mean /
        # unit population-std (ddof=0); near-zero-variance columns get scale 1.0.
        # rsqrt goes to the EUP (free slot) instead of a VALU sqrt + divide.
        mean = jnp.mean(x, axis=0, keepdims=True)
        centered = x - mean
        var = jnp.mean(centered * centered, axis=0, keepdims=True)
        inv_std = jnp.where(var > 1e-12, lax.rsqrt(var), 1.0)
        return centered * inv_std

    pooled_std = standardize(pooled)
    tfidf_std = standardize(tfidf)

    # fc1 on the concatenation [pooled_std, tfidf_std]:
    #   concat @ W1 == pooled_std @ W1[:HIDDEN] + tfidf_std @ W1[HIDDEN:]
    # Kept as two MXU pushes; the K=32 push pads to full MXU depth anyway and the
    # merged (B,256)@(256,128) form would need a lane-concat for marginal gain.
    h = (jnp.dot(pooled_std, w1a_ref[...], preferred_element_type=jnp.float32)
         + jnp.dot(tfidf_std, w1b_ref[...], preferred_element_type=jnp.float32)
         + b1_ref[...])
    h = jnp.maximum(h, 0.0)                                    # torch.relu

    # fc2 into a lane-dense 128-wide output (columns >= NUM_CLASSES have zero
    # weights/bias); avoids masked sub-tile stores.
    out_ref[...] = (jnp.dot(h, w2p_ref[...], preferred_element_type=jnp.float32)
                    + b2p_ref[...])


def prepare_head_params(p):
    """One-time weight layout (done at param-load time, NOT per forward call)."""
    w1 = jnp.asarray(p["fc1_w"], jnp.float32)                  # (FC1_OUT, HIDDEN+PCA)
    w2 = jnp.asarray(p["fc2_w"], jnp.float32)                  # (NUM_CLASSES, FC1_OUT)
    w2p = jnp.zeros((FC1_OUT, LANE), jnp.float32).at[:, :NUM_CLASSES].set(w2.T)
    b2p = jnp.zeros((1, LANE), jnp.float32).at[:, :NUM_CLASSES].set(
        jnp.asarray(p["fc2_b"], jnp.float32))
    return {
        "wp":  jnp.asarray(p["w_pool"], jnp.float32),          # (HIDDEN, HIDDEN) (in,out)
        "bp":  jnp.asarray(p["b_pool"], jnp.float32).reshape(1, HIDDEN),
        "w1a": w1[:, :HIDDEN].T,                               # (HIDDEN, FC1_OUT)
        "w1b": w1[:, HIDDEN:].T,                               # (PCA,    FC1_OUT)
        "b1":  jnp.asarray(p["fc1_b"], jnp.float32).reshape(1, FC1_OUT),
        "w2p": w2p,                                            # (FC1_OUT, LANE)
        "b2p": b2p,                                            # (1, LANE)
    }


def classifier_head(cls_hidden, tfidf, hp):
    """cls_hidden:(B,HIDDEN) tfidf:(B,PCA); hp = prepare_head_params(params)."""
    B = cls_hidden.shape[0]
    vmem = pl.BlockSpec(memory_space=pltpu.MemorySpace.VMEM)   # grid-less, whole arrays
    logits_padded = pl.pallas_call(
        _head_kernel,
        out_shape=jax.ShapeDtypeStruct((B, LANE), jnp.float32),
        in_specs=[vmem] * 9,
        out_specs=vmem,
    )(cls_hidden.astype(jnp.float32), tfidf.astype(jnp.float32),
      hp["wp"], hp["bp"], hp["w1a"], hp["w1b"], hp["b1"], hp["w2p"], hp["b2p"])
    return logits_padded[:, :NUM_CLASSES]


# ===================== small deterministic BERT stand-in =====================
# TODO(synk): pretrained bert-base-uncased weights are replaced by a tiny
#             deterministic synthetic encoder (cannot load checkpoints here).
def init_params(key):
    ks = iter(jax.random.split(key, 24))
    s = 0.02
    nrm = lambda shape: jax.random.normal(next(ks), shape, jnp.float32) * s
    p = {
        "tok_emb": nrm((VOCAB, HIDDEN)),
        "pos_emb": nrm((SEQ, HIDDEN)),
        "wq": nrm((HIDDEN, HIDDEN)), "bq": jnp.zeros((HIDDEN,), jnp.float32),
        "wk": nrm((HIDDEN, HIDDEN)), "bk": jnp.zeros((HIDDEN,), jnp.float32),
        "wv": nrm((HIDDEN, HIDDEN)), "bv": jnp.zeros((HIDDEN,), jnp.float32),
        "wo": nrm((HIDDEN, HIDDEN)), "bo": jnp.zeros((HIDDEN,), jnp.float32),
        "w_ffn1": nrm((HIDDEN, FFN)), "b_ffn1": jnp.zeros((FFN,), jnp.float32),
        "w_ffn2": nrm((FFN, HIDDEN)), "b_ffn2": jnp.zeros((HIDDEN,), jnp.float32),
        "w_pool": nrm((HIDDEN, HIDDEN)), "b_pool": jnp.zeros((HIDDEN,), jnp.float32),
        # classifier head (matches nn.Linear(hidden+PCA, 128) / nn.Linear(128, 5))
        "fc1_w": nrm((FC1_OUT, HIDDEN + PCA_COMPONENTS)),
        "fc1_b": jnp.zeros((FC1_OUT,), jnp.float32),
        "fc2_w": nrm((NUM_CLASSES, FC1_OUT)),
        "fc2_b": jnp.zeros((NUM_CLASSES,), jnp.float32),
    }
    return p


def _layernorm(x, eps=1e-12):
    mu = jnp.mean(x, axis=-1, keepdims=True)
    var = jnp.mean((x - mu) ** 2, axis=-1, keepdims=True)
    return (x - mu) / jnp.sqrt(var + eps)


def bert_cls_hidden(p, input_ids, attention_mask):
    """Returns the (B, HIDDEN) [CLS] hidden state; the pooler dense+tanh is fused
    into the Pallas classifier kernel."""
    B, S = input_ids.shape
    x = p["tok_emb"][input_ids] + p["pos_emb"][None, :S, :]          # (B,S,H)
    x = _layernorm(x)

    q = (x @ p["wq"] + p["bq"]).reshape(B, S, N_HEADS, HEAD_DIM).transpose(0, 2, 1, 3)
    k = (x @ p["wk"] + p["bk"]).reshape(B, S, N_HEADS, HEAD_DIM).transpose(0, 2, 1, 3)
    v = (x @ p["wv"] + p["bv"]).reshape(B, S, N_HEADS, HEAD_DIM).transpose(0, 2, 1, 3)

    scores = jnp.einsum("bhqd,bhkd->bhqk", q, k) / jnp.sqrt(float(HEAD_DIM))
    mask_bias = (1.0 - attention_mask.astype(jnp.float32))[:, None, None, :] * -1e9
    attn = jax.nn.softmax(scores + mask_bias, axis=-1)
    ctx = jnp.einsum("bhqk,bhkd->bhqd", attn, v).transpose(0, 2, 1, 3).reshape(B, S, HIDDEN)

    x = _layernorm(x + ctx @ p["wo"] + p["bo"])
    ffn = jax.nn.gelu(x @ p["w_ffn1"] + p["b_ffn1"]) @ p["w_ffn2"] + p["b_ffn2"]
    x = _layernorm(x + ffn)
    return x[:, 0, :]                                                # [CLS] hidden state


# ================================ full forward ================================
def aigt_classifier_forward(params, head_params, input_ids, attention_mask, tfidf_features):
    cls_hidden = bert_cls_hidden(params, input_ids, attention_mask)  # (B, HIDDEN)
    logits = classifier_head(cls_hidden, tfidf_features, head_params)
    return logits                                                    # (B, NUM_CLASSES)


if __name__ == "__main__":
    key = jax.random.PRNGKey(0)
    k_param, k_ids, k_tfidf = jax.random.split(key, 3)

    params = init_params(k_param)
    head_params = prepare_head_params(params)        # one-time layout, not per forward

    input_ids = jax.random.randint(k_ids, (BATCH, SEQ), 0, VOCAB, dtype=jnp.int32)
    attention_mask = jnp.ones((BATCH, SEQ), dtype=jnp.int32)
    tfidf_features = jax.random.normal(k_tfidf, (BATCH, PCA_COMPONENTS), jnp.float32)

    fwd = jax.jit(aigt_classifier_forward)
    logits = fwd(params, head_params, input_ids, attention_mask, tfidf_features)
    logits = jax.block_until_ready(logits)

    assert logits.shape == (BATCH, NUM_CLASSES)
    assert logits.dtype == jnp.float32
    assert bool(jnp.all(jnp.isfinite(logits)))
    print("KERNEL_OK")
</pallas_src>

<mosaic_0001>
module attributes {stable_mosaic.version = 11 : i64} {
  func.func @_head_kernel(%arg0: memref<8x32xf32, #tpu.memory_space<vmem>>, %arg1: memref<8x128xf32, #tpu.memory_space<vmem>>, %arg2: memref<32x32xf32, #tpu.memory_space<vmem>>, %arg3: memref<1x32xf32, #tpu.memory_space<vmem>>, %arg4: memref<32x128xf32, #tpu.memory_space<vmem>>, %arg5: memref<128x128xf32, #tpu.memory_space<vmem>>, %arg6: memref<1x128xf32, #tpu.memory_space<vmem>>, %arg7: memref<128x128xf32, #tpu.memory_space<vmem>>, %arg8: memref<1x128xf32, #tpu.memory_space<vmem>>, %arg9: memref<8x128xf32, #tpu.memory_space<vmem>>) attributes {dimension_semantics = [], scalar_prefetch = 0 : i64, scratch_operands = 0 : i64, tpu.core_type = #tpu.core_type<tc>} {
    %c0 = arith.constant 0 : index
    %c0_0 = arith.constant 0 : index
    %0 = vector.load %arg0[%c0, %c0_0] : memref<8x32xf32, #tpu.memory_space<vmem>>, vector<8x32xf32>
    %c0_1 = arith.constant 0 : index
    %c0_2 = arith.constant 0 : index
    %1 = vector.load %arg2[%c0_1, %c0_2] : memref<32x32xf32, #tpu.memory_space<vmem>>, vector<32x32xf32>
    %cst = arith.constant dense<0.000000e+00> : vector<8x32xf32>
    %2 = tpu.matmul %0, %1, %cst {dimension_numbers = #tpu.dot_dimension_numbers<[1], [0], [0], [1], [0, 0, 1, 1], [], []>} : vector<8x32xf32>, vector<32x32xf32>, vector<8x32xf32> -> vector<8x32xf32>
    %c0_3 = arith.constant 0 : index
    %c0_4 = arith.constant 0 : index
    %3 = vector.load %arg3[%c0_3, %c0_4] : memref<1x32xf32, #tpu.memory_space<vmem>>, vector<1x32xf32>
    %4 = vector.broadcast %3 : vector<1x32xf32> to vector<8x32xf32>
    %5 = arith.addf %2, %4 : vector<8x32xf32>
    %6 = math.tanh %5 : vector<8x32xf32>
    %c0_5 = arith.constant 0 : index
    %c0_6 = arith.constant 0 : index
    %7 = vector.load %arg1[%c0_5, %c0_6] : memref<8x128xf32, #tpu.memory_space<vmem>>, vector<8x128xf32>
    %cst_7 = arith.constant dense<0.000000e+00> : vector<32xf32>
    %8 = vector.multi_reduction <add>, %6, %cst_7 [0] : vector<8x32xf32> to vector<32xf32>
    %9 = vector.shape_cast %8 : vector<32xf32> to vector<1x32xf32>
    %cst_8 = arith.constant 8.000000e+00 : f32
    %10 = vector.broadcast %cst_8 : f32 to vector<1x32xf32>
    %11 = arith.divf %9, %10 : vector<1x32xf32>
    %12 = vector.broadcast %11 : vector<1x32xf32> to vector<8x32xf32>
    %13 = arith.subf %6, %12 : vector<8x32xf32>
    %14 = arith.mulf %13, %13 : vector<8x32xf32>
    %cst_9 = arith.constant dense<0.000000e+00> : vector<32xf32>
    %15 = vector.multi_reduction <add>, %14, %cst_9 [0] : vector<8x32xf32> to vector<32xf32>
    %16 = vector.shape_cast %15 : vector<32xf32> to vector<1x32xf32>
    %cst_10 = arith.constant 8.000000e+00 : f32
    %17 = vector.broadcast %cst_10 : f32 to vector<1x32xf32>
    %18 = arith.divf %16, %17 : vector<1x32xf32>
    %cst_11 = arith.constant 9.99999996E-13 : f32
    %19 = vector.broadcast %cst_11 : f32 to vector<1x32xf32>
    %20 = arith.cmpf ogt, %18, %19 : vector<1x32xf32>
    %21 = math.rsqrt %18 : vector<1x32xf32>
    %cst_12 = arith.constant 1.000000e+00 : f32
    %22 = vector.broadcast %cst_12 : f32 to vector<1x32xf32>
    %23 = arith.select %20, %21, %22 : vector<1x32xi1>, vector<1x32xf32>
    %24 = vector.broadcast %23 : vector<1x32xf32> to vector<8x32xf32>
    %25 = arith.mulf %13, %24 : vector<8x32xf32>
    %cst_13 = arith.constant dense<0.000000e+00> : vector<128xf32>
    %26 = vector.multi_reduction <add>, %7, %cst_13 [0] : vector<8x128xf32> to vector<128xf32>
    %27 = vector.shape_cast %26 : vector<128xf32> to vector<1x128xf32>
    %cst_14 = arith.constant 8.000000e+00 : f32
    %28 = vector.broadcast %cst_14 : f32 to vector<1x128xf32>
    %29 = arith.divf %27, %28 : vector<1x128xf32>
    %30 = vector.broadcast %29 : vector<1x128xf32> to vector<8x128xf32>
    %31 = arith.subf %7, %30 : vector<8x128xf32>
    %32 = arith.mulf %31, %31 : vector<8x128xf32>
    %cst_15 = arith.constant dense<0.000000e+00> : vector<128xf32>
    %33 = vector.multi_reduction <add>, %32, %cst_15 [0] : vector<8x128xf32> to vector<128xf32>
    %34 = vector.shape_cast %33 : vector<128xf32> to vector<1x128xf32>
    %cst_16 = arith.constant 8.000000e+00 : f32
    %35 = vector.broadcast %cst_16 : f32 to vector<1x128xf32>
    %36 = arith.divf %34, %35 : vector<1x128xf32>
    %cst_17 = arith.constant 9.99999996E-13 : f32
    %37 = vector.broadcast %cst_17 : f32 to vector<1x128xf32>
    %38 = arith.cmpf ogt, %36, %37 : vector<1x128xf32>
    %39 = math.rsqrt %36 : vector<1x128xf32>
    %cst_18 = arith.constant 1.000000e+00 : f32
    %40 = vector.broadcast %cst_18 : f32 to vector<1x128xf32>
    %41 = arith.select %38, %39, %40 : vector<1x128xi1>, vector<1x128xf32>
    %42 = vector.broadcast %41 : vector<1x128xf32> to vector<8x128xf32>
    %43 = arith.mulf %31, %42 : vector<8x128xf32>
    %c0_19 = arith.constant 0 : index
    %c0_20 = arith.constant 0 : index
    %44 = vector.load %arg4[%c0_19, %c0_20] : memref<32x128xf32, #tpu.memory_space<vmem>>, vector<32x128xf32>
    %cst_21 = arith.constant dense<0.000000e+00> : vector<8x128xf32>
    %45 = tpu.matmul %25, %44, %cst_21 {dimension_numbers = #tpu.dot_dimension_numbers<[1], [0], [0], [1], [0, 0, 1, 1], [], []>} : vector<8x32xf32>, vector<32x128xf32>, vector<8x128xf32> -> vector<8x128xf32>
    %c0_22 = arith.constant 0 : index
    %c0_23 = arith.constant 0 : index
    %46 = vector.load %arg5[%c0_22, %c0_23] : memref<128x128xf32, #tpu.memory_space<vmem>>, vector<128x128xf32>
    %cst_24 = arith.constant dense<0.000000e+00> : vector<8x128xf32>
    %47 = tpu.matmul %43, %46, %cst_24 {dimension_numbers = #tpu.dot_dimension_numbers<[1], [0], [0], [1], [0, 0, 1, 1], [], []>} : vector<8x128xf32>, vector<128x128xf32>, vector<8x128xf32> -> vector<8x128xf32>
    %48 = arith.addf %45, %47 : vector<8x128xf32>
    %c0_25 = arith.constant 0 : index
    %c0_26 = arith.constant 0 : index
    %49 = vector.load %arg6[%c0_25, %c0_26] : memref<1x128xf32, #tpu.memory_space<vmem>>, vector<1x128xf32>
    %50 = vector.broadcast %49 : vector<1x128xf32> to vector<8x128xf32>
    %51 = arith.addf %48, %50 : vector<8x128xf32>
    %cst_27 = arith.constant 0.000000e+00 : f32
    %52 = vector.broadcast %cst_27 : f32 to vector<8x128xf32>
    %53 = arith.maximumf %51, %52 : vector<8x128xf32>
    %c0_28 = arith.constant 0 : index
    %c0_29 = arith.constant 0 : index
    %54 = vector.load %arg7[%c0_28, %c0_29] : memref<128x128xf32, #tpu.memory_space<vmem>>, vector<128x128xf32>
    %cst_30 = arith.constant dense<0.000000e+00> : vector<8x128xf32>
    %55 = tpu.matmul %53, %54, %cst_30 {dimension_numbers = #tpu.dot_dimension_numbers<[1], [0], [0], [1], [0, 0, 1, 1], [], []>} : vector<8x128xf32>, vector<128x128xf32>, vector<8x128xf32> -> vector<8x128xf32>
    %c0_31 = arith.constant 0 : index
    %c0_32 = arith.constant 0 : index
    %56 = vector.load %arg8[%c0_31, %c0_32] : memref<1x128xf32, #tpu.memory_space<vmem>>, vector<1x128xf32>
    %57 = vector.broadcast %56 : vector<1x128xf32> to vector<8x128xf32>
    %58 = arith.addf %55, %57 : vector<8x128xf32>
    %c0_33 = arith.constant 0 : index
    %c0_34 = arith.constant 0 : index
    %59 = vector.load %arg9[%c0_33, %c0_34] : memref<8x128xf32, #tpu.memory_space<vmem>>, vector<8x128xf32>
    tpu.vector_store %arg9[%c0_33, %c0_34], %58 {strides = array<i32>} : memref<8x128xf32, #tpu.memory_space<vmem>>, vector<8x128xf32>,
    return
  }
}

</mosaic_0001>

<bundles_post_ra>
// kernel: aigt_classifier_forward.1
= control target key start
LH: loop header
LB: loop body
LE: loop exit
PB: predicated region body
PF: predicated region fallthrough
CT: control target
= control target key end

     0   :  { %v679_v3 = vmov 0.0|0.0   ;;  %vm680_vm0 = vmmov 0   ;;  %v681_v6 = vmov 0.0   ;;  %s912_s0 = inlined_call_operand.vmem [shape: f32[8,32], index: 0, kind: input, shape index: {}]   ;;  %s913_s1 = inlined_call_operand.vmem [shape: f32[8,128], index: 1, kind: input, shape index: {}]   ;;  %s914_s2 = inlined_call_operand.vmem [shape: f32[32,32], index: 2, kind: input, shape index: {}]   ;;  %s915_s3 = inlined_call_operand.vmem [shape: f32[1,32], index: 3, kind: input, shape index: {}]   ;;  %s916_s4 = inlined_call_operand.vmem [shape: f32[32,128], index: 4, kind: input, shape index: {}]   ;;  %s917_s5 = inlined_call_operand.vmem [shape: f32[128,128], index: 5, kind: input, shape index: {}]   ;;  %s918_s6 = inlined_call_operand.vmem [shape: f32[1,128], index: 6, kind: input, shape index: {}]   ;;  %s919_s7 = inlined_call_operand.vmem [shape: f32[128,128], index: 7, kind: input, shape index: {}]   ;;  %s920_s8 = inlined_call_operand.vmem [shape: f32[1,128], index: 8, kind: input, shape index: {}]   ;;  %s921_s9 = inlined_call_operand.hbm [shape: f32[8,128], index: 9, kind: output, shape index: {}]  }
   0x1   :  { %v34_v0 = vld [vmem:[%s914_s2] sm:$0xff]  ;;  %v35_v1 = vld [vmem:[%s914_s2 + $0x8] sm:$0xff]  ;;  %v36_v2 = vld [vmem:[%s914_s2 + $0x10] sm:$0xff]  ;;  %585 = vmatprep.subr.bf16.mxu1 %v679_v3  ;;  %501 = vmatprep.mubr.msk.f32.mxu1 %vm680_vm0, %v681_v6 }
   0x2   :  { %v586_v4 = vpack.c.bf16 %v35_v1, %v34_v0  ;;  %v37_v5 = vld [vmem:[%s914_s2 + $0x18] sm:$0xff]  ;;  %615 = vmatprep.subr.bf16.mxu0 %v679_v3  ;;  %547 = vmatprep.mubr.msk.f32.mxu0 %vm680_vm0, %v681_v6 }
   0x3   :  { %14 = vsyncpa [#allocation3], 0  ;;  %v589_v7 = vpack.c.bf16 %v37_v5, %v36_v2  ;;  %v33_v8 = vld [vmem:[%s912_s0] sm:$0xff]  ;;  %vm45_vm1 = vcmask 261120   ;;  %v169_v13 = vld [vmem:[%s917_s5 + $0x8] sm:$0xff] }
   0x4   :  { %587 = vmatpush3.bf16.msra.mxu1 %v586_v4  ;;  %v120_v9 = vld [vmem:[%s913_s1] sm:$0xff]  ;;  %v170_v14 = vld [vmem:[%s917_s5 + $0x10] sm:$0xff]  ;;  %v171_v17 = vld [vmem:[%s917_s5 + $0x18] sm:$0xff] }
   0x5   :  { %588 = vmatprep.subr.bf16.mxu1 %v679_v3  ;;  %v144_v10 = vrot.slane %v120_v9, 4  ;;  %v168_v12 = vld [vmem:[%s917_s5] sm:$0xff]  ;;  %v595_v19 = vpack.c.bf16 %v171_v17, %v170_v14  ;;  %v173_v21 = vld [vmem:[%s917_s5 + $0x28] sm:$0xff]  ;;  %v166_v26 = vld [vmem:[%s916_s4 + $0x10] sm:$0xff] }
   0x6   :  { %v592_v16 = vpack.c.bf16 %v169_v13, %v168_v12  ;;  %v172_v20 = vld [vmem:[%s917_s5 + $0x20] sm:$0xff]  ;;  %v165_v24 = vld [vmem:[%s916_s4 + $0x8] sm:$0xff]  ;;  %v167_v27 = vld [vmem:[%s916_s4 + $0x18] sm:$0xff] }
   0x7   :  { %v145_v11 = vadd.f32 %v144_v10, %v120_v9  ;;  %v164_v22 = vld [vmem:[%s916_s4] sm:$0xff]  ;;  %v598_v29 = vpack.c.bf16 %v173_v21, %v172_v20  ;;  %v174_v30 = vld [vmem:[%s917_s5 + $0x30] sm:$0xff]  ;;  %v175_v31 = vld [vmem:[%s917_s5 + $0x38] sm:$0xff]  ;;  %v619_v32 = vpack.c.bf16 %v167_v27, %v166_v26  ;;  %s682_s4 = smov [#allocation2]  }
   0x8   :  { %590 = vmatpush3.bf16.msra.mxu1 %v589_v7  ;;  %v616_v25 = vpack.c.bf16 %v165_v24, %v164_v22  ;;  %v601_v35 = vpack.c.bf16 %v175_v31, %v174_v30  ;;  %v176_v36 = vld [vmem:[%s917_s5 + $0x40] sm:$0xff]  ;;  %v177_v37 = vld [vmem:[%s917_s5 + $0x48] sm:$0xff]  ;;  %v178_v41 = vld [vmem:[%s917_s5 + $0x50] sm:$0xff]  ;;  %s436_s20 = sshll.u32 %s682_s4, 4  ;;  %s437_s20 = int_to_ptr.vmem [resolvable:$true] %s436_s20 }
   0x9   :  { %591 = vmatprep.subr.bf16.mxu1 %v679_v3  ;;  %v146_v15 = vrot.slane %v145_v11, 2  ;;  %v604_v40 = vpack.c.bf16 %v177_v37, %v176_v36  ;;  %v179_v42 = vld [vmem:[%s917_s5 + $0x58] sm:$0xff]  ;;  %v180_v46 = vld [vmem:[%s917_s5 + $0x60] sm:$0xff]  ;;  %v181_v47 = vld [vmem:[%s917_s5 + $0x68] sm:$0xff]  ;;  %p660_p1 = scmp.lt.s32.totalorder %s437_s20, %s437_s20 }
   0xa   :  { %617 = vmatpush3.bf16.msra.mxu0 %v616_v25  ;;  %v607_v45 = vpack.c.bf16 %v179_v42, %v178_v41  ;;  %v610_v50 = vpack.c.bf16 %v181_v47, %v180_v46  ;;  %v182_v51 = vld [vmem:[%s917_s5 + $0x70] sm:$0xff]  ;;  %v183_v52 = vld [vmem:[%s917_s5 + $0x78] sm:$0xff]  ;;  %v444_v59 = vld [vmem:[%s915_s3] ss:$0 sm:$0xff] }
   0xb   :  { %502 = vmatmul.mubr.msk.f32.vlgmr.msra.gmra.mrb[0].mxu1 %vm45_vm1, %v33_v8  ;;  %v147_v18 = vadd.f32 %v146_v15, %v145_v11  ;;  %618 = vmatprep.subr.bf16.mxu0 %v679_v3  ;;  %v613_v55 = vpack.c.bf16 %v183_v52, %v182_v51  ;;  %v336_v20 = vld [vmem:[%s919_s7] sm:$0xff]  ;;  %v337_v21 = vld [vmem:[%s919_s7 + $0x8] sm:$0xff]  ;;  %v338_v26 = vld [vmem:[%s919_s7 + $0x10] sm:$0xff] }
   0xc   :  { %536 = vmatprep.mubr.msk.f32.mxu1 %vm680_vm0, %v681_v6  ;;  %593 = vmatpush3.bf16.msra.mxu1 %v592_v16  ;;  %v622_v24 = vpack.c.bf16 %v337_v21, %v336_v20  ;;  %v339_v27 = vld [vmem:[%s919_s7 + $0x18] sm:$0xff]  ;;  %v341_v30 = vld [vmem:[%s919_s7 + $0x28] sm:$0xff]  ;;  %v346_v37 = vld [vmem:[%s919_s7 + $0x50] sm:$0xff] }
   0xd   :  { %594 = vmatprep.subr.bf16.mxu1 %v679_v3  ;;  %v148_v23 = vrot.slane %v147_v18, 1  ;;  %v349_v41 = vld [vmem:[%s919_s7 + $0x68] sm:$0xff]  ;;  %v351_v46 = vld [vmem:[%s919_s7 + $0x78] sm:$0xff] }
   0xe   :  { %620 = vmatpush3.bf16.msra.mxu0 %v619_v32  ;;  %v342_v32 = vld [vmem:[%s919_s7 + $0x30] sm:$0xff] }
   0xf   :  { %v149_v28 = vadd.f32 %v148_v23, %v147_v18  ;;  %621 = vmatprep.subr.bf16.mxu0 %v679_v3 }
  0x10   :  { %596 = vmatpush3.bf16.msra.mxu1 %v595_v19 }
  0x11   :  { %597 = vmatprep.subr.bf16.mxu1 %v679_v3  ;;  %v150_v33 = vmul.f32 0.125, %v149_v28  ;;  %v625_v28 = vpack.c.bf16 %v339_v27, %v338_v26 }
  0x13   :  { %v151_v34 = vsub.f32 %v120_v9, %v150_v33 }
  0x14   :  { %599 = vmatpush3.bf16.msra.mxu1 %v598_v29  ;;  %v340_v29 = vld [vmem:[%s919_s7 + $0x20] sm:$0xff] }
  0x15   :  { %600 = vmatprep.subr.bf16.mxu1 %v679_v3  ;;  %v152_v38 = vmul.f32 %v151_v34, %v151_v34  ;;  %v628_v31 = vpack.c.bf16 %v341_v30, %v340_v29 }
  0x17   :  { %v153_v39 = vrot.slane %v152_v38, 4 }
  0x18   :  { %602 = vmatpush3.bf16.msra.mxu1 %v601_v35  ;;  %v345_v35 = vld [vmem:[%s919_s7 + $0x48] sm:$0xff] }
  0x19   :  { %603 = vmatprep.subr.bf16.mxu1 %v679_v3  ;;  %v154_v43 = vadd.f32 %v153_v39, %v152_v38  ;;  %v347_v38 = vld [vmem:[%s919_s7 + $0x58] sm:$0xff] }
  0x1a   :  { %v637_v39 = vpack.c.bf16 %v347_v38, %v346_v37 }
  0x1b   :  { %v155_v44 = vrot.slane %v154_v43, 2 }
  0x1c   :  { %605 = vmatpush3.bf16.msra.mxu1 %v604_v40  ;;  %v348_v40 = vld [vmem:[%s919_s7 + $0x60] sm:$0xff] }
  0x1d   :  { %606 = vmatprep.subr.bf16.mxu1 %v679_v3  ;;  %v156_v48 = vadd.f32 %v155_v44, %v154_v43  ;;  %v640_v42 = vpack.c.bf16 %v349_v41, %v348_v40 }
  0x1f   :  { %v157_v49 = vrot.slane %v156_v48, 1 }
  0x20   :  { %608 = vmatpush3.bf16.msra.mxu1 %v607_v45  ;;  %v350_v45 = vld [vmem:[%s919_s7 + $0x70] sm:$0xff] }
  0x21   :  { %609 = vmatprep.subr.bf16.mxu1 %v679_v3  ;;  %v158_v53 = vadd.f32 %v157_v49, %v156_v48  ;;  %v643_v47 = vpack.c.bf16 %v351_v46, %v350_v45  ;;  %v447_v49 = vld [vmem:[%s918_s6] ss:$0 sm:$0xff] }
  0x23   :  { %v159_v54 = vmul.f32 0.125, %v158_v53 }
  0x24   :  { %611 = vmatpush3.bf16.msra.mxu1 %v610_v50 }
  0x25   :  { %612 = vmatprep.subr.bf16.mxu1 %v679_v3  ;;  %649 = vrsqrt.f32 %v159_v54  ;;  %vm160_vm2 = vcmp.gt.f32.partialorder %v159_v54, 1e-12 }
  0x28   :  { %614 = vmatpush3.bf16.msra.mxu1 %v613_v55 }
  0x2f   :  { %v650_v56 = vpop.eup %649 }
  0x30   :  { %v162_v57 = vsel %vm160_vm2, %v650_v56, 1.0 }
  0x31   :  { %v163_v58 = vmul.f32 %v162_v57, %v151_v34  ;;  %v344_v34 = vld [vmem:[%s919_s7 + $0x40] sm:$0xff] }
  0x32   :  { %v634_v36 = vpack.c.bf16 %v345_v35, %v344_v34 }
  0x33   :  { %537 = vmatmul.mubr.f32.vlgmr.msra.gmra.mrb[2].mxu1 %v163_v58 }
  0xde   :  { %v115_v60 = vpop.f32.mrb[0].mxu1 }
  0xdf   :  { %v116_v61 = vadd.f32 %v444_v59, %v115_v60  ;;  %v503_v62 = vpop.f32.mrb[1].mxu1 }
  0xe1   :  { %651 = vtanh.f32 %v116_v61 }
  0xeb   :  { %v652_v63 = vpop.eup %651 }
  0xec   :  { %v121_v0 = vsel %vm45_vm1, %v652_v63, 0.0 }
  0xed   :  { %v122_v1 = vrot.slane %v121_v0, 4 }
  0xef   :  { %v123_v2 = vadd.f32 %v122_v1, %v121_v0 }
  0xf1   :  { %v124_v4 = vrot.slane %v123_v2, 2 }
  0xf3   :  { %v125_v5 = vadd.f32 %v124_v4, %v123_v2 }
  0xf5   :  { %v126_v7 = vrot.slane %v125_v5, 1 }
  0xf7   :  { %v127_v8 = vadd.f32 %v126_v7, %v125_v5 }
  0xf9   :  { %v129_v9 = vmul.f32 0.125, %v127_v8 }
  0xfb   :  { %v130_v10 = vsub.f32 %v652_v63, %v129_v9 }
  0xfd   :  { %v131_v11 = vmul.f32 %v130_v10, %v130_v10 }
  0xff   :  { %v132_v12 = vsel %vm45_vm1, %v131_v11, 0.0 }
 0x100   :  { %v133_v13 = vrot.slane %v132_v12, 4 }
 0x102   :  { %v134_v14 = vadd.f32 %v133_v13, %v132_v12 }
 0x104   :  { %v135_v15 = vrot.slane %v134_v14, 2 }
 0x106   :  { %v136_v16 = vadd.f32 %v135_v15, %v134_v14  ;;  %v250_v43 = vpop.f32.mrb[2].mxu1 }
 0x107   :  { %v538_v44 = vpop.f32.mrb[3].mxu1 }
 0x108   :  { %v137_v17 = vrot.slane %v136_v16, 1 }
 0x10a   :  { %v138_v18 = vadd.f32 %v137_v17, %v136_v16 }
 0x10c   :  { %v139_v19 = vmul.f32 0.125, %v138_v18 }
 0x10e   :  { %653 = vrsqrt.f32 %v139_v19  ;;  %vm140_vm3 = vcmp.gt.f32.partialorder %v139_v19, 1e-12 }
 0x118   :  { %v654_v22 = vpop.eup %653 }
 0x119   :  { %v142_v23 = vsel %vm140_vm3, %v654_v22, 1.0 }
 0x11a   :  { %v143_v25 = vmul.f32 %v142_v23, %v130_v10 }
 0x11c   :  { %548 = vmatmul.mubr.msk.f32.vlgmr.msra.gmra.mrb[0].mxu0 %vm45_vm1, %v143_v25 }
 0x11d   :  { %623 = vmatpush3.bf16.msra.mxu0 %v622_v24  ;;  %582 = vmatprep.mubr.msk.f32.mxu0 %vm680_vm0, %v681_v6  ;;  %v343_v6 = vld [vmem:[%s919_s7 + $0x38] sm:$0xff]  ;;  %s655_s7 = scalar_lea.vmem %s437_s20, 128 }
 0x11e   :  { %624 = vmatprep.subr.bf16.mxu0 %v679_v3  ;;  %v631_v33 = vpack.c.bf16 %v343_v6, %v342_v32  ;;  %p656_p0 = scmp.ne.s32.totalorder %s437_s20, %s655_s7  ;;  %p661_p2 = scmp.lt.s32.totalorder %s655_s7, %s655_s7 }
 0x120   :  { %p662_p3 = por %p661_p2, %p660_p1 }
 0x121   :  { %626 = vmatpush3.bf16.msra.mxu0 %v625_v28 }
 0x122   :  { %627 = vmatprep.subr.bf16.mxu0 %v679_v3  ;;  %p663_p4 = pnand %p662_p3, %p656_p0 }
 0x125   :  { %629 = vmatpush3.bf16.msra.mxu0 %v628_v31 }
 0x126   :  { %630 = vmatprep.subr.bf16.mxu0 %v679_v3 }
 0x129   :  { %632 = vmatpush3.bf16.msra.mxu0 %v631_v33 }
 0x12a   :  { %633 = vmatprep.subr.bf16.mxu0 %v679_v3 }
 0x12d   :  { %635 = vmatpush3.bf16.msra.mxu0 %v634_v36 }
 0x12e   :  { %636 = vmatprep.subr.bf16.mxu0 %v679_v3 }
 0x131   :  { %638 = vmatpush3.bf16.msra.mxu0 %v637_v39 }
 0x132   :  { %639 = vmatprep.subr.bf16.mxu0 %v679_v3 }
 0x135   :  { %641 = vmatpush3.bf16.msra.mxu0 %v640_v42 }
 0x136   :  { %642 = vmatprep.subr.bf16.mxu0 %v679_v3  ;;  %v448_v3 = vld [vmem:[%s920_s8] ss:$0 sm:$0xff] }
 0x139   :  { %644 = vmatpush3.bf16.msra.mxu0 %v643_v47 }
 0x1ef   :  { %v323_v48 = vpop.f32.mrb[0].mxu0 }
 0x1f0   :  { %v324_v50 = vadd.f32 %v323_v48, %v250_v43  ;;  %v549_v51 = vpop.f32.mrb[1].mxu0 }
 0x1f2   :  { %v334_v52 = vadd.f32 %v447_v49, %v324_v50 }
 0x1f4   :  { %v335_v53 = vmax.f32 %v334_v52, 0.0 }
 0x1f6   :  { %583 = vmatmul.mubr.f32.vlgmr.msra.gmra.mrb[2].mxu0 %v335_v53 }
 0x2c9   :  { %v425_v54 = vpop.f32.mrb[2].mxu0 }
 0x2ca   :  { %v426_v55 = vadd.f32 %v448_v3, %v425_v54  ;;  %v584_v56 = vpop.f32.mrb[3].mxu0 }
 0x2cc   :  { %429 = vst [vmem:[#allocation2] sm:$0xff] %v426_v55 }
 0x2cd   :  { %666 = shalt.err (!%p663_p4)
}
 0x2ce   :  { %s667_s22 = scalar_lea.hbm %s921_s9, 128 }
 0x2cf   :  { %p668_p5 = scmp.ne.s32.totalorder %s921_s9, %s667_s22  ;;  %p671_p6 = scmp.lt.u32.totalorder %s667_s22, %s921_s9 }
 0x2d1   :  { %p673_p7 = pnand %p671_p6, %p668_p5 }
 0x2d3   :  { %676 = shalt.err (!%p673_p7)
}
 0x2d4   :  { %439 = dma.vmem_to_hbm [thread:$0]  %s437_s20, 128, %s921_s9, [#allocation3]  }
 0x2d5   :  { %677 = dma.done.wait [#allocation3], 128  }
 0x2d6   :  { %678 = vsyncadd [#allocation3], 4294967168 }
 0x2d7   :  { %443 = vsyncpa [#allocation3], 1 }

</bundles_post_ra>
